<compile_context>
chip_gen: v7x
topology: tpu7x:2x2x1
jax: 0.10.0
libtpu: 0.0.40
codegen_flags: <defaults>
</compile_context>

<pallas_src>
import functools
import math

import jax
import jax.numpy as jnp
from jax.experimental import pallas as pl
from jax.experimental.pallas import tpu as pltpu


def _pick_head_block(H, D):
    """Smallest divisor of H (preferring >= 2 to amortize grid-step overhead) whose
    output slab hb*D is lane-dense (multiple of 128).  Falls back to all heads, whose
    slab equals the full output dim and is therefore always a legal block shape."""
    divisors = [hb for hb in range(1, H + 1) if H % hb == 0]
    for hb in divisors:
        if hb >= min(2, H) and (hb * D) % 128 == 0:
            return hb
    for hb in divisors:
        if (hb * D) % 128 == 0:
            return hb
    return H


def _pick_kv_block(S):
    """KV tile size: full S for short sequences, otherwise the largest 128-multiple
    tile (<= 512) dividing S so the K/V/mask BlockSpecs stay (8,128)-legal."""
    if S <= 512:
        return S
    for tk in (512, 256, 128):
        if S % tk == 0:
            return tk
    return S  # odd sequence lengths: no KV tiling


def _attn_kernel(scale, q_ref, k_ref, v_ref, m_ref, o_ref, m_scr, l_scr, acc_scr):
    # Block shapes:
    #   q_ref: (1, hb, S, D)      k_ref / v_ref: (1, hb, tk, D)
    #   m_ref: (1, 1, tk) f32     o_ref: (1, S, hb*D)
    #   m_scr / l_scr: (hb, S, 1) f32 scratch; acc_scr: (hb, S, D) f32 scratch
    kv_step = pl.program_id(2)
    num_kv = pl.num_programs(2)

    @pl.when(kv_step == 0)
    def _init():
        m_scr[...] = jnp.full(m_scr.shape, -jnp.inf, dtype=m_scr.dtype)
        l_scr[...] = jnp.zeros(l_scr.shape, dtype=l_scr.dtype)
        acc_scr[...] = jnp.zeros(acc_scr.shape, dtype=acc_scr.dtype)

    # Fold 1/sqrt(head_dim) into Q (hb*S*D mults instead of hb*S*tk on the scores).
    q = q_ref[0] * scale                     # (hb, S, D), input dtype
    k = k_ref[0]                             # (hb, tk, D)
    v = v_ref[0]                             # (hb, tk, D)

    # Additive mask bias for this key tile, computed once and shared across heads.
    neg_bias = (m_ref[0] - 1.0) * 1000000.0  # (1, tk) f32

    # scores[h, q, k] = sum_d Q[h,q,d] * K[h,k,d]  — contraction over the last dims of
    # both operands (no K transpose / relayout), f32 accumulation on the MXU.
    s = jnp.einsum("hqd,hkd->hqk", q, k,
                   preferred_element_type=jnp.float32)            # (hb, S, tk) f32
    s = s + neg_bias[None]                                         # mask the key axis

    # Online-softmax update over the KV grid axis (all accumulators in f32).
    m_prev = m_scr[...]                                            # (hb, S, 1)
    m_new = jnp.maximum(m_prev, jnp.max(s, axis=-1, keepdims=True))
    alpha = jnp.exp(m_prev - m_new)                                # rescale factor
    p = jnp.exp(s - m_new)                                         # (hb, S, tk)
    l_scr[...] = alpha * l_scr[...] + jnp.sum(p, axis=-1, keepdims=True)
    acc_scr[...] = alpha * acc_scr[...] + jnp.einsum(
        "hqk,hkd->hqd", p.astype(v.dtype), v,
        preferred_element_type=jnp.float32)                        # (hb, S, D) f32
    m_scr[...] = m_new

    @pl.when(kv_step == num_kv - 1)
    def _finalize():
        acc = acc_scr[...]                                         # (hb, S, D) f32
        denom = l_scr[...]                                         # (hb, S, 1) f32
        if o_ref.dtype == jnp.float32:
            out = acc / denom                  # exact divide: meets f32 tolerances
        else:
            out = acc * pl.reciprocal(denom, approx=True)          # EUP vrcp
        hb = acc.shape[0]
        # Single lane-dense store: relayout (hb, S, D) -> (S, hb*D) and write once.
        slab = jnp.concatenate([out[h] for h in range(hb)], axis=-1)
        o_ref[0] = slab.astype(o_ref.dtype)


def softmax_attention(Q, K, V, mask, head_dim):
    B, H, S, D = Q.shape
    assert mask.shape == (B, S)
    scale = 1.0 / math.sqrt(head_dim)

    hb = _pick_head_block(H, D)
    tk = _pick_kv_block(S)

    # [B, S] -> [B, 1, S] f32: (8,128)-legal block shapes, one tiny row per key tile,
    # and the index_map is independent of the head axis (no re-DMA per head step).
    mask3 = mask.reshape(B, 1, S).astype(jnp.float32)

    q_spec = pl.BlockSpec((1, hb, S, D), lambda b, h, kv: (b, h, 0, 0))
    kv_spec = pl.BlockSpec((1, hb, tk, D), lambda b, h, kv: (b, h, kv, 0))
    m_spec = pl.BlockSpec((1, 1, tk), lambda b, h, kv: (b, 0, kv))
    o_spec = pl.BlockSpec((1, S, hb * D), lambda b, h, kv: (b, 0, h))  # lane-dense slab

    out_flat = pl.pallas_call(
        functools.partial(_attn_kernel, scale),
        out_shape=jax.ShapeDtypeStruct((B, S, H * D), Q.dtype),
        grid_spec=pltpu.PrefetchScalarGridSpec(
            num_scalar_prefetch=0,
            grid=(B, H // hb, S // tk),
            in_specs=[q_spec, kv_spec, kv_spec, m_spec],
            out_specs=o_spec,
            scratch_shapes=[
                pltpu.VMEM((hb, S, 1), jnp.float32),   # running max
                pltpu.VMEM((hb, S, 1), jnp.float32),   # running sum
                pltpu.VMEM((hb, S, D), jnp.float32),   # running weighted accumulator
            ],
        ),
        compiler_params=pltpu.CompilerParams(
            dimension_semantics=("parallel", "parallel", "arbitrary"),
            vmem_limit_bytes=32 * 1024 * 1024,         # headroom vs v5e's 16 MiB default
        ),
    )(Q, K, V, mask3)

    # [B, S, H*D] -> [B, H, S, D]: layout plumbing outside the kernel.
    return out_flat.reshape(B, S, H, D).transpose(0, 2, 1, 3)


def _reference(Q, K, V, mask, head_dim):
    # HIGHEST precision so the reference is f32-accurate on a TPU backend.
    dot = jnp.einsum("bhqd,bhkd->bhqk", Q, K,
                     preferred_element_type=jnp.float32,
                     precision=jax.lax.Precision.HIGHEST)
    dot = dot / math.sqrt(head_dim)
    dot = dot - 1000000.0 * (1.0 - mask[:, None, None, :])
    attn = jax.nn.softmax(dot, axis=-1)
    return jnp.einsum("bhqk,bhkd->bhqd", attn, V,
                      preferred_element_type=jnp.float32,
                      precision=jax.lax.Precision.HIGHEST)


if __name__ == "__main__":
    # config = {'dropout_prob': 0.0, 'head_dim': 64}
    head_dim = 64

    def run_case(B, H, S, D, dtype, atol, rtol, key):
        kq, kk, kvk, km = jax.random.split(key, 4)
        Q = jax.random.normal(kq, (B, H, S, D), dtype=jnp.float32)
        K = jax.random.normal(kk, (B, H, S, D), dtype=jnp.float32)
        V = jax.random.normal(kvk, (B, H, S, D), dtype=jnp.float32)
        mask = (jax.random.uniform(km, (B, S)) > 0.3).astype(jnp.float32)
        mask = mask.at[:, 0].set(1.0)          # at least one valid key per row
        ref = _reference(Q, K, V, mask, head_dim)
        out = softmax_attention(Q.astype(dtype), K.astype(dtype), V.astype(dtype),
                                mask, head_dim)
        out = jax.block_until_ready(out)
        assert out.shape == (B, H, S, D)
        err = float(jnp.max(jnp.abs(out.astype(jnp.float32) - ref)))
        assert jnp.allclose(out.astype(jnp.float32), ref, atol=atol, rtol=rtol), err
        return err

    key = jax.random.PRNGKey(0)
    k1, k2, k3 = jax.random.split(key, 3)

    # Tolerances: the compiled Mosaic kernel accumulates in f32 (multi-pass MXU) and
    # lands ~1e-6 off the HIGHEST-precision reference; the looser f32 bound also covers
    # run modes where the kernel's f32 matmuls take the MXU's default bf16-input path
    # (e.g. interpret mode on a TPU backend).
    run_case(2, 4, 8, 64, jnp.float32, 5e-2, 5e-2, k1)     # head-blocked grid (2,2,1)
    run_case(1, 4, 256, 64, jnp.float32, 5e-2, 5e-2, k2)   # multi-step KV axis (1,2,2)
    run_case(2, 4, 8, 64, jnp.bfloat16, 1e-1, 1e-1, k3)    # bf16 MXU fast path

    print("KERNEL_OK")
</pallas_src>

<mosaic_0001>
module attributes {stable_mosaic.version = 11 : i64} {
  func.func @_attn_kernel(%arg0: i32, %arg1: i32, %arg2: i32, %arg3: memref<1x2x8x64xf32, #tpu.memory_space<vmem>>, %arg4: memref<1x2x8x64xf32, #tpu.memory_space<vmem>>, %arg5: memref<1x2x8x64xf32, #tpu.memory_space<vmem>>, %arg6: memref<1x1x8xf32, #tpu.memory_space<vmem>>, %arg7: memref<1x8x128xf32, #tpu.memory_space<vmem>>, %arg8: memref<2x8x1xf32, #tpu.memory_space<vmem>>, %arg9: memref<2x8x1xf32, #tpu.memory_space<vmem>>, %arg10: memref<2x8x64xf32, #tpu.memory_space<vmem>>) attributes {dimension_semantics = [#tpu.dimension_semantics<parallel>, #tpu.dimension_semantics<parallel>, #tpu.dimension_semantics<arbitrary>], iteration_bounds = array<i64: 2, 2, 1>, scalar_prefetch = 0 : i64, scratch_operands = 3 : i64, tpu.core_type = #tpu.core_type<tc>, window_params = [{transform_indices = @transform_0, window_bounds = array<i64: 1, 2, 8, 64>}, {transform_indices = @transform_1, window_bounds = array<i64: 1, 2, 8, 64>}, {transform_indices = @transform_2, window_bounds = array<i64: 1, 2, 8, 64>}, {transform_indices = @transform_3, window_bounds = array<i64: 1, 1, 8>}, {transform_indices = @transform_4, window_bounds = array<i64: 1, 8, 128>}]} {
    %c0_i32 = arith.constant 0 : i32
    %0 = arith.cmpi eq, %arg2, %c0_i32 : i32
    %1 = arith.extui %0 : i1 to i32
    %c0_i32_0 = arith.constant 0 : i32
    %2 = arith.cmpi ne, %1, %c0_i32_0 : i32
    scf.if %2 {
      %cst_41 = arith.constant 0xFF800000 : f32
      %46 = vector.broadcast %cst_41 : f32 to vector<2x8x1xf32>
      %c0_42 = arith.constant 0 : index
      %c0_43 = arith.constant 0 : index
      %c0_44 = arith.constant 0 : index
      %47 = vector.load %arg8[%c0_42, %c0_43, %c0_44] : memref<2x8x1xf32, #tpu.memory_space<vmem>>, vector<2x8x1xf32>
      tpu.vector_store %arg8[%c0_42, %c0_43, %c0_44], %46 {strides = array<i32>} : memref<2x8x1xf32, #tpu.memory_space<vmem>>, vector<2x8x1xf32>,
      %cst_45 = arith.constant 0.000000e+00 : f32
      %48 = vector.broadcast %cst_45 : f32 to vector<2x8x1xf32>
      %c0_46 = arith.constant 0 : index
      %c0_47 = arith.constant 0 : index
      %c0_48 = arith.constant 0 : index
      %49 = vector.load %arg9[%c0_46, %c0_47, %c0_48] : memref<2x8x1xf32, #tpu.memory_space<vmem>>, vector<2x8x1xf32>
      tpu.vector_store %arg9[%c0_46, %c0_47, %c0_48], %48 {strides = array<i32>} : memref<2x8x1xf32, #tpu.memory_space<vmem>>, vector<2x8x1xf32>,
      %cst_49 = arith.constant 0.000000e+00 : f32
      %50 = vector.broadcast %cst_49 : f32 to vector<2x8x64xf32>
      %c0_50 = arith.constant 0 : index
      %c0_51 = arith.constant 0 : index
      %c0_52 = arith.constant 0 : index
      %51 = vector.load %arg10[%c0_50, %c0_51, %c0_52] : memref<2x8x64xf32, #tpu.memory_space<vmem>>, vector<2x8x64xf32>
      tpu.vector_store %arg10[%c0_50, %c0_51, %c0_52], %50 {strides = array<i32>} : memref<2x8x64xf32, #tpu.memory_space<vmem>>, vector<2x8x64xf32>,
    } else {
    }
    %c0 = arith.constant 0 : index
    %c0_1 = arith.constant 0 : index
    %c0_2 = arith.constant 0 : index
    %c0_3 = arith.constant 0 : index
    %3 = vector.load %arg3[%c0, %c0_1, %c0_2, %c0_3] : memref<1x2x8x64xf32, #tpu.memory_space<vmem>>, vector<1x2x8x64xf32>
    %4 = vector.shape_cast %3 : vector<1x2x8x64xf32> to vector<2x8x64xf32>
    %cst = arith.constant 1.250000e-01 : f32
    %5 = vector.broadcast %cst : f32 to vector<2x8x64xf32>
    %6 = arith.mulf %4, %5 : vector<2x8x64xf32>
    %c0_4 = arith.constant 0 : index
    %c0_5 = arith.constant 0 : index
    %c0_6 = arith.constant 0 : index
    %c0_7 = arith.constant 0 : index
    %7 = vector.load %arg4[%c0_4, %c0_5, %c0_6, %c0_7] : memref<1x2x8x64xf32, #tpu.memory_space<vmem>>, vector<1x2x8x64xf32>
    %8 = vector.shape_cast %7 : vector<1x2x8x64xf32> to vector<2x8x64xf32>
    %c0_8 = arith.constant 0 : index
    %c0_9 = arith.constant 0 : index
    %c0_10 = arith.constant 0 : index
    %c0_11 = arith.constant 0 : index
    %9 = vector.load %arg5[%c0_8, %c0_9, %c0_10, %c0_11] : memref<1x2x8x64xf32, #tpu.memory_space<vmem>>, vector<1x2x8x64xf32>
    %10 = vector.shape_cast %9 : vector<1x2x8x64xf32> to vector<2x8x64xf32>
    %c0_12 = arith.constant 0 : index
    %c0_13 = arith.constant 0 : index
    %c0_14 = arith.constant 0 : index
    %11 = vector.load %arg6[%c0_12, %c0_13, %c0_14] : memref<1x1x8xf32, #tpu.memory_space<vmem>>, vector<1x1x8xf32>
    %12 = vector.shape_cast %11 : vector<1x1x8xf32> to vector<1x8xf32>
    %cst_15 = arith.constant 1.000000e+00 : f32
    %13 = vector.broadcast %cst_15 : f32 to vector<1x8xf32>
    %14 = arith.subf %12, %13 : vector<1x8xf32>
    %cst_16 = arith.constant 1.000000e+06 : f32
    %15 = vector.broadcast %cst_16 : f32 to vector<1x8xf32>
    %16 = arith.mulf %14, %15 : vector<1x8xf32>
    "tpu.trace_start"() <{level = 10 : i32, message = "hqd,hkd->hqk"}> : () -> ()
    %cst_17 = arith.constant dense<0.000000e+00> : vector<2x8x8xf32>
    %17 = tpu.matmul %6, %8, %cst_17 {dimension_numbers = #tpu.dot_dimension_numbers<[2], [2], [1], [1], [0, 0, 0, 1, 1, 1], [0], [0]>} : vector<2x8x64xf32>, vector<2x8x64xf32>, vector<2x8x8xf32> -> vector<2x8x8xf32>
    "tpu.trace_stop"() : () -> ()
    %18 = vector.shape_cast %16 : vector<1x8xf32> to vector<1x1x8xf32>
    %19 = vector.broadcast %18 : vector<1x1x8xf32> to vector<2x8x8xf32>
    %20 = arith.addf %17, %19 : vector<2x8x8xf32>
    %c0_18 = arith.constant 0 : index
    %c0_19 = arith.constant 0 : index
    %c0_20 = arith.constant 0 : index
    %21 = vector.load %arg8[%c0_18, %c0_19, %c0_20] : memref<2x8x1xf32, #tpu.memory_space<vmem>>, vector<2x8x1xf32>
    %cst_21 = arith.constant dense<0xFF800000> : vector<2x8xf32>
    %22 = vector.multi_reduction <maximumf>, %20, %cst_21 [2] : vector<2x8x8xf32> to vector<2x8xf32>
    %23 = vector.shape_cast %22 : vector<2x8xf32> to vector<2x8x1xf32>
    %24 = arith.maximumf %21, %23 : vector<2x8x1xf32>
    %25 = arith.subf %21, %24 : vector<2x8x1xf32>
    %26 = math.exp %25 : vector<2x8x1xf32>
    %27 = vector.broadcast %24 : vector<2x8x1xf32> to vector<2x8x8xf32>
    %28 = arith.subf %20, %27 : vector<2x8x8xf32>
    %29 = math.exp %28 : vector<2x8x8xf32>
    %c0_22 = arith.constant 0 : index
    %c0_23 = arith.constant 0 : index
    %c0_24 = arith.constant 0 : index
    %30 = vector.load %arg9[%c0_22, %c0_23, %c0_24] : memref<2x8x1xf32, #tpu.memory_space<vmem>>, vector<2x8x1xf32>
    %31 = arith.mulf %26, %30 : vector<2x8x1xf32>
    %cst_25 = arith.constant dense<0.000000e+00> : vector<2x8xf32>
    %32 = vector.multi_reduction <add>, %29, %cst_25 [2] : vector<2x8x8xf32> to vector<2x8xf32>
    %33 = vector.shape_cast %32 : vector<2x8xf32> to vector<2x8x1xf32>
    %34 = arith.addf %31, %33 : vector<2x8x1xf32>
    %c0_26 = arith.constant 0 : index
    %c0_27 = arith.constant 0 : index
    %c0_28 = arith.constant 0 : index
    %35 = vector.load %arg9[%c0_26, %c0_27, %c0_28] : memref<2x8x1xf32, #tpu.memory_space<vmem>>, vector<2x8x1xf32>
    tpu.vector_store %arg9[%c0_26, %c0_27, %c0_28], %34 {strides = array<i32>} : memref<2x8x1xf32, #tpu.memory_space<vmem>>, vector<2x8x1xf32>,
    %c0_29 = arith.constant 0 : index
    %c0_30 = arith.constant 0 : index
    %c0_31 = arith.constant 0 : index
    %36 = vector.load %arg10[%c0_29, %c0_30, %c0_31] : memref<2x8x64xf32, #tpu.memory_space<vmem>>, vector<2x8x64xf32>
    %37 = vector.broadcast %26 : vector<2x8x1xf32> to vector<2x8x64xf32>
    %38 = arith.mulf %37, %36 : vector<2x8x64xf32>
    "tpu.trace_start"() <{level = 10 : i32, message = "hqk,hkd->hqd"}> : () -> ()
    %cst_32 = arith.constant dense<0.000000e+00> : vector<2x8x64xf32>
    %39 = tpu.matmul %29, %10, %cst_32 {dimension_numbers = #tpu.dot_dimension_numbers<[2], [1], [1], [2], [0, 0, 0, 1, 1, 2], [0], [0]>} : vector<2x8x8xf32>, vector<2x8x64xf32>, vector<2x8x64xf32> -> vector<2x8x64xf32>
    "tpu.trace_stop"() : () -> ()
    %40 = arith.addf %38, %39 : vector<2x8x64xf32>
    %c0_33 = arith.constant 0 : index
    %c0_34 = arith.constant 0 : index
    %c0_35 = arith.constant 0 : index
    %41 = vector.load %arg10[%c0_33, %c0_34, %c0_35] : memref<2x8x64xf32, #tpu.memory_space<vmem>>, vector<2x8x64xf32>
    tpu.vector_store %arg10[%c0_33, %c0_34, %c0_35], %40 {strides = array<i32>} : memref<2x8x64xf32, #tpu.memory_space<vmem>>, vector<2x8x64xf32>,
    %c0_36 = arith.constant 0 : index
    %c0_37 = arith.constant 0 : index
    %c0_38 = arith.constant 0 : index
    %42 = vector.load %arg8[%c0_36, %c0_37, %c0_38] : memref<2x8x1xf32, #tpu.memory_space<vmem>>, vector<2x8x1xf32>
    tpu.vector_store %arg8[%c0_36, %c0_37, %c0_38], %24 {strides = array<i32>} : memref<2x8x1xf32, #tpu.memory_space<vmem>>, vector<2x8x1xf32>,
    %c0_i32_39 = arith.constant 0 : i32
    %43 = arith.cmpi eq, %arg2, %c0_i32_39 : i32
    %44 = arith.extui %43 : i1 to i32
    %c0_i32_40 = arith.constant 0 : i32
    %45 = arith.cmpi ne, %44, %c0_i32_40 : i32
    scf.if %45 {
      %c0_41 = arith.constant 0 : index
      %c0_42 = arith.constant 0 : index
      %c0_43 = arith.constant 0 : index
      %46 = vector.load %arg10[%c0_41, %c0_42, %c0_43] : memref<2x8x64xf32, #tpu.memory_space<vmem>>, vector<2x8x64xf32>
      %c0_44 = arith.constant 0 : index
      %c0_45 = arith.constant 0 : index
      %c0_46 = arith.constant 0 : index
      %47 = vector.load %arg9[%c0_44, %c0_45, %c0_46] : memref<2x8x1xf32, #tpu.memory_space<vmem>>, vector<2x8x1xf32>
      %48 = vector.broadcast %47 : vector<2x8x1xf32> to vector<2x8x64xf32>
      %49 = arith.divf %46, %48 : vector<2x8x64xf32>
      %50 = vector.extract_strided_slice %49 {offsets = [0, 0, 0], sizes = [1, 8, 64], strides = [1, 1, 1]} : vector<2x8x64xf32> to vector<1x8x64xf32>
      %51 = vector.shape_cast %50 : vector<1x8x64xf32> to vector<8x64xf32>
      %52 = vector.extract_strided_slice %49 {offsets = [1, 0, 0], sizes = [1, 8, 64], strides = [1, 1, 1]} : vector<2x8x64xf32> to vector<1x8x64xf32>
      %53 = vector.shape_cast %52 : vector<1x8x64xf32> to vector<8x64xf32>
      %54 = tpu.concatenate %51, %53 in 1 : vector<8x64xf32>, vector<8x64xf32> -> vector<8x128xf32>
      %c0_47 = arith.constant 0 : index
      %c0_48 = arith.constant 0 : index
      %c0_49 = arith.constant 0 : index
      %55 = vector.load %arg7[%c0_47, %c0_48, %c0_49] : memref<1x8x128xf32, #tpu.memory_space<vmem>>, vector<1x8x128xf32>
      %56 = vector.shape_cast %55 : vector<1x8x128xf32> to vector<8x128xf32>
      %57 = vector.shape_cast %54 : vector<8x128xf32> to vector<1x8x128xf32>
      tpu.vector_store %arg7[%c0_47, %c0_48, %c0_49], %57 {strides = array<i32>} : memref<1x8x128xf32, #tpu.memory_space<vmem>>, vector<1x8x128xf32>,
    } else {
    }
    return
  }
  func.func @transform_0(%arg0: i32, %arg1: i32, %arg2: i32) -> (i32, i32, i32, i32) {
    %c0_i32 = arith.constant 0 : i32
    %c0_i32_0 = arith.constant 0 : i32
    %c0_i32_1 = arith.constant 0 : i32
    return %arg0, %arg1, %c0_i32, %c0_i32_0 : i32, i32, i32, i32
  }
  func.func @transform_1(%arg0: i32, %arg1: i32, %arg2: i32) -> (i32, i32, i32, i32) {
    %c0_i32 = arith.constant 0 : i32
    %c0_i32_0 = arith.constant 0 : i32
    return %arg0, %arg1, %arg2, %c0_i32 : i32, i32, i32, i32
  }
  func.func @transform_2(%arg0: i32, %arg1: i32, %arg2: i32) -> (i32, i32, i32, i32) {
    %c0_i32 = arith.constant 0 : i32
    %c0_i32_0 = arith.constant 0 : i32
    return %arg0, %arg1, %arg2, %c0_i32 : i32, i32, i32, i32
  }
  func.func @transform_3(%arg0: i32, %arg1: i32, %arg2: i32) -> (i32, i32, i32) {
    %c0_i32 = arith.constant 0 : i32
    %c0_i32_0 = arith.constant 0 : i32
    return %arg0, %c0_i32, %arg2 : i32, i32, i32
  }
  func.func @transform_4(%arg0: i32, %arg1: i32, %arg2: i32) -> (i32, i32, i32) {
    %c0_i32 = arith.constant 0 : i32
    %c0_i32_0 = arith.constant 0 : i32
    return %arg0, %c0_i32, %arg1 : i32, i32, i32
  }
}

</mosaic_0001>

<bundles_post_ra>
// kernel: tpu_custom_call.1
= control target key start
LH: loop header
LB: loop body
LE: loop exit
PB: predicated region body
PF: predicated region fallthrough
CT: control target
= control target key end

     0   :  { %s1685_s0 = inlined_call_operand.hbm [shape: f32[2,4,8,64], index: 0, kind: input, shape index: {}]   ;;  %s1686_s1 = inlined_call_operand.hbm [shape: f32[2,4,8,64], index: 1, kind: input, shape index: {}]   ;;  %s1687_s2 = inlined_call_operand.hbm [shape: f32[2,4,8,64], index: 2, kind: input, shape index: {}]   ;;  %s1688_s3 = inlined_call_operand.vmem [shape: f32[2,1,8], index: 3, kind: input, shape index: {}]   ;;  %s1689_s4 = inlined_call_operand.hbm [shape: f32[2,8,256], index: 4, kind: output, shape index: {}]  }
   0x1   :  { %1701 = sst [smem:[#allocation20_spill]] %s1685_s0 }
   0x2   :  { %1702 = sst [smem:[#allocation21_spill]] %s1686_s1 }
   0x3   :  { %9 = vsyncpa [#allocation6], 0 }
   0x4   :  { %11 = vsyncpa [#allocation6 + $0x1], 0 }
   0x5   :  { %12 = vsyncpa [#allocation9], 0 }
   0x6   :  { %14 = vsyncpa [#allocation9 + $0x1], 0 }
   0x7   :  { %15 = vsyncpa [#allocation7], 0 }
   0x8   :  { %17 = vsyncpa [#allocation7 + $0x1], 0  ;;  %s1351_s15 = smov 0   ;;  %s1353_s16 = smov 0  }
   0x9   :  { %s1355_s17 = smov 0   ;;  %s1357_s18 = smov 0  }
   0xa   :  { %s1359_s19 = smov 0   ;;  %s1361_s20 = smov 0  }
   0xb   :  { %s1363_s21 = smov 0   ;;  %s1365_s22 = smov 0  }
   0xc LB: > { %1703 = sst [smem:[#allocation15_spill]] %s1305_s20  ;;  %s1392_s23 = sadd.s32 4294967295, %s1313_s22   ;;  %s1313_s22 = sphi %s1365_s22, %s23_s22   ;;  %s1309_s21 = sphi %s1363_s21, %s1729_s21   ;;  %s1305_s20 = sphi %s1361_s20, %s1728_s20   ;;  %s1301_s19 = sphi %s1359_s19, %s1727_s19   ;;  %s1297_s18 = sphi %s1357_s18, %s1726_s18   ;;  %s1293_s17 = sphi %s1355_s17, %s1732_s17   ;;  %s1289_s16 = sphi %s1353_s16, %s1731_s16   ;;  %s1285_s15 = sphi %s1351_s15, %s1730_s15  }
   0xd   : > { %1704 = sst [smem:[#allocation16_spill]] %s1309_s21  ;;  %s952_s24 = sadd.s32 4294967294, %s1313_s22  }
   0xe   : > { %s38_s25 = sadd.s32 1, %s1305_s20  ;;  %s42_s26 = sadd.s32 1, %s1309_s21 }
   0xf   : > { %p40_p0 = scmp.ge.s32.totalorder %s38_s25, 2  ;;  %s51_s27 = sadd.s32 1, %s1293_s17 }
  0x10   : > { %p58_p1 = scmp.ne.s32.totalorder %s1293_s17, %s1289_s16  ;;  %p59_p2 = scmp.eq.s32.totalorder %s1313_s22, 0 }
  0x11   : > { %s1734_s25 = smov (%p40_p0, %s38_s25), 0  ;;  %s1736_s26 = smov (!%p40_p0, %s42_s26), %s1309_s21 }
  0x12   : > { %1705 = sst [smem:[#allocation17_spill]] %s1734_s25  ;;  %s47_s28 = ssub.s32 %s1305_s20, %s1734_s25 }
  0x13   : > { %p1406_p3 = por %p59_p2, %p58_p1  ;;  %p44_p4 = scmp.ge.s32.totalorder %s1736_s26, 2 }
  0x14   : > { %p64_p5 = scmp.ne.s32.totalorder %s1289_s16, %s1285_s15  ;;  %p65_p6 = scmp.eq.s32.totalorder %s1392_s23, 0 }
  0x15   : > { %p178_p7 = scmp.eq.s32.totalorder %s1392_s23, 3  ;;  %s1738_s26 = smov (%p44_p4, %s1736_s26), 0 }
  0x16   : > { %1707 = sst [smem:[#allocation18_spill]] %s1738_s26  ;;  %p1416_p8 = por %p65_p6, %p64_p5 }
  0x17   : > { %p1420_p9 = por %p178_p7, %p58_p1  ;;  %s46_s6 = ssub.s32 %s1309_s21, %s1738_s26 }
  0x18   : > { %s1708_s30 = scalar_select %p1416_p8, 1, 0 }
  0x19   : > { %s1709_s5 = scalar_select %p1420_p9, 1, 0 }
  0x1a   : > { %p184_p10 = scmp.eq.s32.totalorder %s952_s24, 3  ;;  %s48_s7 = sor.u32 %s47_s28, %s46_s6 }
  0x1b   : > { %p49_p11 = scmp.eq.s32.totalorder %s48_s7, 0  ;;  %p1034_p13 = scmp.lt.s32.totalorder %s1313_s22, 4 }
  0x1c   : > { %p1426_p12 = por %p184_p10, %p64_p5  ;;  %s1691_s9 = sand.u32 1, %s1293_s17  }
  0x1d   : > { %s1433_s10 = scalar_select %p49_p11, %s1293_s17, %s51_s27  }
  0x1e   : > { %s1710_s8 = scalar_select %p1426_p12, 1, 0 }
  0x1f   : > { %1711 = sst [smem:[#allocation19_spill]] %s1433_s10  ;;  %s1437_s11 = sshll.u32 %s1691_s9, 4 }
  0x20   : > { %s956_s12 = sshll.u32 %s1305_s20, 1  ;;  %s957_s13 = sshll.u32 %s1309_s21, 2 }
  0x21   : > { %p1443_p0 = pnand %p1034_p13, %p1406_p3  ;;  %s214_s24 = sadd.s32 %s957_s13, %s956_s12 }
  0x22   : > { %s1447_s28 = sshll.u32 %s214_s24, 7  ;;  %s227_s6 = sand.u32 1, %s1313_s22  }
  0x23   : > { %s1713_s1 = sld [smem:[#allocation21_spill]]  ;;  %s231_s29 = scalar_lea.vmem [#allocation8], %s1437_s11 }
  0x24   : > { %s241_s9 = sshll.u32 %s231_s29, 4  ;;  %s1460_s25 = scalar_lea.sflag [#allocation9], %s227_s6  ;;  %s1457_s9 = int_to_ptr.vmem [resolvable:$true] %s241_s9 }
  0x25   : > { %p1466_p3 = pneg %p1443_p0 }
  0x29   : > { %s1454_s26 = scalar_lea.hbm %s1713_s1, %s1447_s28  ;;  %s1126_s27 = scalar_lea.hbm %s1713_s1, 1024 }
  0x2a   : > { %s1121_s12 = scalar_lea.hbm %s1454_s26, 256  ;;  %p1127_p6 = scmp.lt.u32.totalorder %s1454_s26, %s1713_s1 }
  0x2b   : > { %p1122_p2 = scmp.ne.s32.totalorder %s1454_s26, %s1121_s12  ;;  %p1128_p7 = scmp.lt.u32.totalorder %s1126_s27, %s1121_s12 }
  0x2c   : > { %p1130_p11 = scmp.lt.u32.totalorder %s1121_s12, %s1454_s26 }
  0x2d   : > { %p1124_p4 = pnand %p1466_p3, %p1122_p2  ;;  %p1129_p10 = por %p1128_p7, %p1127_p6 }
  0x2f   : > { %p1125_p5 = pneg %p1124_p4  ;;  %p1131_p13 = por %p1130_p11, %p1129_p10 }
  0x31   : > { %p1132_p1 = pnand %p1131_p13, %p1125_p5 }
  0x33   : > { %1135 = shalt.err (!%p1132_p1)
}
  0x34   : > { %s1136_s6 = scalar_lea.vmem %s1457_s9, 256  ;;  %s1315_s24 = smov [#allocation8]  }
  0x35   : > { %p1137_p2 = scmp.ne.s32.totalorder %s1457_s9, %s1136_s6  ;;  %s1141_s7 = sshll.u32 %s1315_s24, 4  ;;  %s1142_s7 = int_to_ptr.vmem [resolvable:$false] %s1141_s7 }
  0x36   : > { %s1143_s21 = scalar_lea.vmem %s1142_s7, 512  ;;  %p1144_p9 = scmp.lt.s32.totalorder %s1457_s9, %s1142_s7 }
  0x37   : > { %p1139_p4 = pnand %p1137_p2, %p1466_p3  ;;  %p1145_p8 = scmp.lt.s32.totalorder %s1143_s21, %s1136_s6 }
  0x39   : > { %p1140_p12 = pneg %p1139_p4  ;;  %p1146_p6 = por %p1145_p8, %p1144_p9 }
  0x3b   : > { %p1147_p7 = pnand %p1146_p6, %p1140_p12 }
  0x3d   : > { %1150 = shalt.err (!%p1147_p7)
}
  0x3e   : > { %s1696_s12 = smov 128   ;;  %s1698_s27 = smov 8  }
  0x3f   : > { %1026 = dma.hbm_to_vmem [thread:$0]  (!%p1443_p0), %s1454_s26, 256, %s1457_s9, %s1460_s25, %s1696_s12, %s1696_s12, %s1698_s27  }
  0x40   : > { %p282_p8 = scmp.lt.s32.totalorder %s1313_s22, 5  ;;  %p1715_p9 = scmp.ge.s32.totalorder %s1313_s22, 1 }
  0x41   : > { %s1717_s0 = sld [smem:[#allocation20_spill]]  ;;  %s208_s21 = scalar_lea.vmem [#allocation5], %s1437_s11 }
  0x42   : > { %p1496_p12 = pnand %p1715_p9, %p282_p8  ;;  %s217_s1 = sshll.u32 %s208_s21, 4  ;;  %s1507_s1 = int_to_ptr.vmem [resolvable:$true] %s217_s1 }
  0x43   : > { %s1718_s26 = sand.u32 1, %s1293_s17  }
  0x44   : > { %s1716_s29 = scalar_select %p1496_p12, 1, 0 }
  0x45   : > { %s1511_s9 = scalar_lea.sflag [#allocation6], %s1718_s26 }
  0x47   : > { %s1504_s7 = scalar_lea.hbm %s1717_s0, %s1447_s28  ;;  %s1156_s24 = scalar_lea.hbm %s1717_s0, 1024 }
  0x48   : > { %s1151_s12 = scalar_lea.hbm %s1504_s7, 256  ;;  %p1157_p11 = scmp.lt.u32.totalorder %s1504_s7, %s1717_s0 }
  0x49   : > { %p1152_p1 = scmp.ne.s32.totalorder %s1504_s7, %s1151_s12  ;;  %p1158_p13 = scmp.lt.u32.totalorder %s1156_s24, %s1151_s12 }
  0x4a   : > { %p1160_p4 = scmp.lt.u32.totalorder %s1151_s12, %s1504_s7 }
  0x4b   : > { %p1154_p5 = pnand %p1152_p1, %p1466_p3  ;;  %p1159_p2 = por %p1158_p13, %p1157_p11 }
  0x4d   : > { %p1155_p10 = pneg %p1154_p5  ;;  %p1161_p6 = por %p1160_p4, %p1159_p2 }
  0x4f   : > { %p1162_p7 = pnand %p1161_p6, %p1155_p10 }
  0x51   : > { %1165 = shalt.err (!%p1162_p7)
}
  0x52   : > { %s1166_s21 = scalar_lea.vmem %s1507_s1, 256  ;;  %s1318_s27 = smov [#allocation5]  }
  0x53   : > { %p1167_p8 = scmp.ne.s32.totalorder %s1507_s1, %s1166_s21  ;;  %s1171_s26 = sshll.u32 %s1318_s27, 4  ;;  %s1172_s26 = int_to_ptr.vmem [resolvable:$false] %s1171_s26 }
  0x54   : > { %s1173_s20 = scalar_lea.vmem %s1172_s26, 512  ;;  %p1174_p5 = scmp.lt.s32.totalorder %s1507_s1, %s1172_s26 }
  0x55   : > { %p1169_p9 = pnand %p1167_p8, %p1466_p3  ;;  %p1175_p12 = scmp.lt.s32.totalorder %s1173_s20, %s1166_s21 }
  0x57   : > { %p1170_p1 = pneg %p1169_p9  ;;  %p1176_p11 = por %p1175_p12, %p1174_p5 }
  0x59   : > { %p1177_p13 = pnand %p1176_p11, %p1170_p1 }
  0x5b   : > { %1180 = shalt.err (!%p1177_p13)
}
  0x5c   : > { %s1719_s10 = smov 8   ;;  %s1720_s12 = smov 128  }
  0x5d   : > { %1023 = dma.hbm_to_vmem [thread:$0]  (!%p1443_p0), %s1504_s7, 256, %s1507_s1, %s1511_s9, %s1720_s12, %s1720_s12, %s1719_s10  }
  0x5e   : > { %s1542_s27 = scalar_lea.hbm %s1687_s2, %s1447_s28  ;;  %s255_s21 = scalar_lea.vmem [#allocation10], %s1437_s11 }
  0x5f   : > { %s265_s26 = sshll.u32 %s255_s21, 4  ;;  %s1181_s20 = scalar_lea.hbm %s1542_s27, 256  ;;  %s1545_s26 = int_to_ptr.vmem [resolvable:$true] %s265_s26 }
  0x60   : > { %p1182_p12 = scmp.ne.s32.totalorder %s1542_s27, %s1181_s20  ;;  %s1186_s7 = scalar_lea.hbm %s1687_s2, 1024 }
  0x61   : > { %p1187_p4 = scmp.lt.u32.totalorder %s1542_s27, %s1687_s2  ;;  %p1188_p6 = scmp.lt.u32.totalorder %s1186_s7, %s1181_s20 }
  0x62   : > { %p1184_p10 = pnand %p1182_p12, %p1466_p3  ;;  %p1190_p8 = scmp.lt.u32.totalorder %s1181_s20, %s1542_s27 }
  0x63   : > { %p1189_p7 = por %p1188_p6, %p1187_p4 }
  0x64   : > { %p1185_p2 = pneg %p1184_p10 }
  0x65   : > { %p1191_p9 = por %p1190_p8, %p1189_p7 }
  0x67   : > { %p1192_p1 = pnand %p1191_p9, %p1185_p2 }
  0x69   : > { %1195 = shalt.err (!%p1192_p1)
}
  0x6a   : > { %s1196_s11 = scalar_lea.vmem %s1545_s26, 256  ;;  %s1319_s0 = smov [#allocation10]  }
  0x6b   : > { %p1197_p5 = scmp.ne.s32.totalorder %s1545_s26, %s1196_s11  ;;  %s1201_s6 = sshll.u32 %s1319_s0, 4  ;;  %s1202_s6 = int_to_ptr.vmem [resolvable:$false] %s1201_s6 }
  0x6c   : > { %s1203_s24 = scalar_lea.vmem %s1202_s6, 512  ;;  %p1204_p12 = scmp.lt.s32.totalorder %s1545_s26, %s1202_s6 }
  0x6d   : > { %p1199_p11 = pnand %p1197_p5, %p1466_p3  ;;  %p1205_p10 = scmp.lt.s32.totalorder %s1203_s24, %s1196_s11 }
  0x6f   : > { %p1200_p13 = pneg %p1199_p11  ;;  %p1206_p4 = por %p1205_p10, %p1204_p12 }
  0x71   : > { %p1207_p6 = pnand %p1206_p4, %p1200_p13 }
  0x73   : > { %1210 = shalt.err (!%p1207_p6)
}
  0x74   : > { %1029 = dma.hbm_to_vmem [thread:$0]  (!%p1443_p0), %s1542_s27, 256, %s1545_s26, %s1460_s25, %s1720_s12, %s1720_s12, %s1719_s10  }
  0x75   : > { %p1721_p3 = scmp.ne.s32.totalorder %s1716_s29, 0 }
  0x76   : > { %s1575_s13 = sand.u32 (!%p1721_p3), 1, %s1289_s16   ;;  %p1722_p2 = scmp.ne.s32.totalorder (!%p1721_p3), %s1708_s30, 0 }
  0x77   : > { %286 = sbr.rel (%p1721_p3) target bundleno = 1062 (0x426), region = 36  ;;  %s1578_s21 = sshll.u32 (!%p1721_p3), %s1575_s13, 4 }
  0x78   : > { %s289_s14 = scalar_lea.sflag (!%p1721_p3), [#allocation6], %s1575_s13  ;;  %s292_s20 = scalar_lea.vmem (!%p1721_p3), [#allocation5], %s1578_s21 }
  0x7e   : > { %1272 = dma.done.wait (%p1722_p2), %s289_s14, 256  }
  0x7f   : > { %1274 = vsyncadd (%p1722_p2), %s289_s14, 4294967040  ;;  %s297_s25 = sand.u32 1, %s1392_s23   ;;  %s301_s10 = scalar_lea.vmem [#allocation8], %s1578_s21 }
  0x80   : > { %s298_s29 = scalar_lea.sflag [#allocation9], %s297_s25 }
  0x81   : > { %1276 = dma.done.wait (%p1722_p2), %s298_s29, 512  }
  0x82   : > { %1278 = vsyncadd (%p1722_p2), %s298_s29, 4294966784  ;;  %vm369_vm0 = vcmask 523264   ;;  %v1320_v0 = vmov 0.0   ;;  %vm1321_vm1 = vmmov 0   ;;  %v377_v1 = vld [vmem:[%s301_s10 + $0x8] sm:$0xff]  ;;  %v376_v3 = vld [vmem:[%s301_s10] sm:$0xff]  ;;  %v384_v8 = vlaneseq }
  0x83   : > { %997 = vmatprep.subr.mxu1 %v1320_v0  ;;  %370 = vst.msk [vmem:[#allocation4] sm:$0xff] %vm369_vm0, %v1320_v0  ;;  %371 = vst.msk [vmem:[#allocation4 + $0x8] sm:$0xff] %vm369_vm0, %v1320_v0  ;;  %999 = vmatprep.mubr.msk.f32.mxu1 %vm1321_vm1, %v1320_v0  ;;  %v373_v2 = vld [vmem:[%s292_s20 + $0x8] sm:$0xff]  ;;  %v372_v5 = vld [vmem:[%s292_s20] sm:$0xff]  ;;  %vm364_vm2 = vcmask 7168   ;;  %v1322_v7 = vmov -inf  }
  0x84   : > { %992 = vmatprep.subr.mxu0 %v1320_v0  ;;  %994 = vmatprep.mubr.msk.f32.mxu0 %vm1321_vm1, %v1320_v0  ;;  %v375_v4 = vmul.f32 0.125, %v373_v2  ;;  %v374_v6 = vmul.f32 0.125, %v372_v5  ;;  %366 = vst.msk [vmem:[#allocation2 + $0x8] sm:$0xff] %vm364_vm2, %v1322_v7  ;;  %365 = vst.msk [vmem:[#allocation2] sm:$0xff] %vm364_vm2, %v1322_v7  ;;  %p354_p0 = scmp.lt.s32.totalorder %s1301_s19, 1  ;;  %v385_v11 = vshrl.u32 %v384_v8, 7 }
  0x85   : > { %998 = vmatpush3.xpose.msk.msra.mxu1 %vm369_vm0, %v377_v1  ;;  %993 = vmatpush3.xpose.msk.msra.mxu0 %vm369_vm0, %v376_v3  ;;  %367 = vst.msk [vmem:[#allocation3] sm:$0xff] %vm364_vm2, %v1320_v0  ;;  %368 = vst.msk [vmem:[#allocation3 + $0x8] sm:$0xff] %vm364_vm2, %v1320_v0  ;;  %vm544_vm3 = vcmask 64512   ;;  %v1323_v23 = vmov 0   ;;  %s310_s26 = scalar_lea.vmem [#allocation10], %s1578_s21  ;;  %s1324_s1 = smov 64  }
  0x86   : > { %1007 = vmatprep.subr.mxu1 %v1320_v0  ;;  %1002 = vmatprep.subr.mxu0 %v1320_v0  ;;  %s355_s23 = scalar_select %p354_p0, %s1301_s19, 1  ;;  %v386_v13 = vsub.s32 0, %v385_v11  ;;  %v379_v32 = vld [vmem:[%s310_s26 + $0x8] sm:$0xff]  ;;  %v378_v33 = vld [vmem:[%s310_s26] sm:$0xff] }
  0x87   : > { %1107 = vset.pattern.permute.xlu1 %v1323_v23  ;;  %1108 = vset.pattern.permute.xlu0 %v1323_v23  ;;  %s971_s7 = sshll.u32 %s1575_s13, 3  ;;  %s980_s9 = sshll.u32 %s1301_s19, 1 }
  0x88   : > { %1000 = vmatmul.mubr.msk.f32.vlgmr.msra.gmra.mrb[0].mxu1 %vm369_vm0, %v375_v4  ;;  %995 = vmatmul.mubr.msk.f32.vlgmr.msra.gmra.mrb[0].mxu0 %vm369_vm0, %v374_v6  ;;  %s359_s27 = scalar_lea.vmem %s1688_s3, %s355_s23  ;;  %s795_s28 = sadd.s32 %s1297_s18, %s980_s9 }
  0x89   : > { %1009 = vmatprep.mubr.msk.f32.mxu1 %vm1321_vm1, %v1320_v0  ;;  %1004 = vmatprep.mubr.msk.f32.mxu0 %vm1321_vm1, %v1320_v0  ;;  %v380_v9 = vld [vmem:[%s359_s27] sm:$0x1]  ;;  %s981_s11 = sshll.u32 %s795_s28, 7  ;;  %s350_s0 = scalar_lea.vmem [#allocation11], %s971_s7 }
  0x8a   : > { %v972_v10 = vadd.f32 -1.0, %v380_v9  ;;  %1008 = vmatpush3.msra.mxu1 %v379_v32  ;;  %1003 = vmatpush3.msra.mxu0 %v378_v33  ;;  %v591_v59 = vld [vmem:[#allocation4 + $0x8] sm:$0xff]  ;;  %v590_v61 = vld [vmem:[#allocation4] sm:$0xff]  ;;  %s799_s6 = sshll.u32 %s350_s0, 4  ;;  %s1630_s14 = scalar_lea.hbm %s1689_s4, %s981_s11  ;;  %s1632_s6 = int_to_ptr.vmem [resolvable:$true] %s799_s6 }
  0x8b   : > { %v543_v24 = vld [vmem:[#allocation2 + $0x8] sm:$0xff]  ;;  %v542_v27 = vld [vmem:[#allocation2] sm:$0xff]  ;;  %s784_s18 = scalar_lea.sflag [#allocation7], %s1575_s13  ;;  %s1211_s19 = scalar_lea.vmem %s1632_s6, 128 }
  0x8c   : > { %v382_v12 = vmul.f32 1000000.0, %v972_v10  ;;  %v576_v48 = vld [vmem:[#allocation3 + $0x8] sm:$0xff]  ;;  %v575_v51 = vld [vmem:[#allocation3] sm:$0xff]  ;;  %p1212_p7 = scmp.ne.s32.totalorder %s1632_s6, %s1211_s19  ;;  %p1723_p8 = scmp.ne.s32.totalorder %s1709_s5, 0 }
  0x8d   : > { %s1325_s20 = smov [#allocation11]  }
  0x8e   : > { %v387_v14 = vrot.slane %v382_v12, %v386_v13  ;;  %p1213_p9 = pnand %p1212_p7, %p1723_p8  ;;  %s1215_s25 = sshll.u32 %s1325_s20, 4  ;;  %s1216_s25 = int_to_ptr.vmem [resolvable:$false] %s1215_s25 }
  0x8f   : > { %s1217_s29 = scalar_lea.vmem %s1216_s25, 256  ;;  %p1218_p5 = scmp.lt.s32.totalorder %s1632_s6, %s1216_s25 }
  0x90   : > { %p1214_p1 = pneg %p1213_p9  ;;  %p1219_p11 = scmp.lt.s32.totalorder %s1217_s29, %s1211_s19 }
  0x92   : > { %p1220_p13 = por %p1219_p11, %p1218_p5 }
  0x94   : > { %p1221_p12 = pnand %p1220_p13, %p1214_p1 }
 0x15b   : > { %v538_v15 = vpop.f32.mrb[0].mxu1  ;;  %v462_v16 = vpop.f32.mrb[0].mxu0 }
 0x15c   : > { %v539_v17 = vadd.f32 %v538_v15, %v387_v14  ;;  %v1001_v18 = vpop.f32.mrb[1].mxu1  ;;  %v463_v19 = vadd.f32 %v462_v16, %v387_v14  ;;  %v996_v20 = vpop.f32.mrb[1].mxu0 }
 0x15e   : > { %v548_v21 = vsel %vm544_vm3, %v539_v17, -inf  ;;  %v545_v22 = vsel %vm544_vm3, %v463_v19, -inf }
 0x15f   : > { %549 = vmax.xlane.f32.xlu0 %v548_v21 }
 0x163   : > { %546 = vmax.xlane.f32.xlu0 %v545_v22 }
 0x1ec   : > { %v550_v25 = vpop.xlane.xlu0 %549 }
 0x1ed   : > { %v552_v26 = vmax.f32 %v543_v24, %v550_v25 }
 0x1ef   : > { %v554_v28 = vsub.f32 %v543_v24, %v552_v26  ;;  %755 = vst.msk [vmem:[#allocation2 + $0x8] sm:$0xff] %vm364_vm2, %v552_v26  ;;  %566 = vperm.xlu1 %1107, %v552_v26  }
 0x1f0   : > { %v547_v29 = vpop.xlane.xlu0 %546 }
 0x1f1   : > { %v551_v30 = vmax.f32 %v542_v27, %v547_v29  ;;  %v557_v44 = vmul.f32 1.442695, %v554_v28 }
 0x1f3   : > { %v553_v31 = vsub.f32 %v542_v27, %v551_v30  ;;  %754 = vst.msk [vmem:[#allocation2] sm:$0xff] %vm364_vm2, %v551_v30  ;;  %561 = vperm.xlu1 %1107, %v551_v30  }
 0x1f5   : > { %v555_v45 = vmul.f32 1.442695, %v553_v31 }
 0x26e   : > { %v567_v34 = vpop.permute.xlu1 %566 }
 0x26f   : > { %v570_v35 = vsub.f32 %v539_v17, %v567_v34 }
 0x271   : > { %v573_v36 = vmul.f32 1.442695, %v570_v35 }
 0x272   : > { %v562_v37 = vpop.permute.xlu1 %561 }
 0x273   : > { %1109 = vpow2.f32 %v573_v36  ;;  %v569_v38 = vsub.f32 %v463_v19, %v562_v37 }
 0x275   : > { %v571_v39 = vmul.f32 1.442695, %v569_v38 }
 0x277   : > { %1111 = vpow2.f32 %v571_v39 }
 0x278   : > { %1113 = vpow2.f32 %v557_v44 }
 0x279   : > { %1115 = vpow2.f32 %v555_v45 }
 0x27d   : > { %v1110_v40 = vpop.eup %1109 }
 0x27e   : > { %1010 = vmatmul.mubr.msk.f32.vlgmr.msra.gmra.mrb[2].mxu1 %vm544_vm3, %v1110_v40  ;;  %v582_v41 = vsel %vm544_vm3, %v1110_v40, 0.0 }
 0x27f   : > { %583 = vadd.xlane.f32.xlu0 %v582_v41 }
 0x281   : > { %v1112_v42 = vpop.eup %1111 }
 0x282   : > { %1005 = vmatmul.mubr.msk.f32.vlgmr.msra.gmra.mrb[2].mxu0 %vm544_vm3, %v1112_v42  ;;  %v579_v43 = vsel %vm544_vm3, %v1112_v42, 0.0  ;;  %v1114_v46 = vpop.eup %1113 }
 0x283   : > { %580 = vadd.xlane.f32.xlu1 %v579_v43  ;;  %v1116_v47 = vpop.eup %1115  ;;  %v578_v49 = vmul.f32 %v1114_v46, %v576_v48 }
 0x284   : > { %v577_v53 = vmul.f32 %v1116_v47, %v575_v51 }
 0x295   : > { %599 = vperm.xlu0 %1108, %v1114_v46  }
 0x299   : > { %594 = vperm.xlu0 %1108, %v1116_v47  }
 0x30c   : > { %v584_v50 = vpop.xlane.xlu0 %583 }
 0x30d   : > { %v586_v52 = vadd.f32 %v584_v50, %v578_v49 }
 0x30f   : > { %589 = vst.msk [vmem:[#allocation3 + $0x8] sm:$0xff] %vm364_vm2, %v586_v52 }
 0x310   : > { %v581_v54 = vpop.xlane.xlu1 %580 }
 0x311   : > { %v585_v55 = vadd.f32 %v581_v54, %v577_v53 }
 0x313   : > { %588 = vst.msk [vmem:[#allocation3] sm:$0xff] %vm364_vm2, %v585_v55 }
 0x314   : > { %v600_v58 = vpop.permute.xlu0 %599 }
 0x315   : > { %v603_v60 = vmul.f32 %v600_v58, %v591_v59 }
 0x316   : > { %v762_v56 = vld [vmem:[#allocation3 + $0x8] sm:$0xff] }
 0x317   : > { %770 = vperm.xlu1 %1107, %v762_v56  }
 0x318   : > { %v595_v62 = vpop.permute.xlu0 %594 }
 0x319   : > { %v602_v2 = vmul.f32 %v595_v62, %v590_v61 }
 0x31a   : > { %v761_v57 = vld [vmem:[#allocation3] sm:$0xff] }
 0x31b   : > { %765 = vperm.xlu0 %1108, %v761_v57  }
 0x351   : > { %v746_v63 = vpop.f32.mrb[2].mxu1 }
 0x352   : > { %v751_v0 = vadd.f32 %v746_v63, %v603_v60  ;;  %v1011_v1 = vpop.f32.mrb[3].mxu1 }
 0x354   : > { %753 = vst.msk [vmem:[#allocation4 + $0x8] sm:$0xff] %vm369_vm0, %v751_v0 }
 0x355   : > { %v673_v3 = vpop.f32.mrb[2].mxu0 }
 0x356   : > { %v750_v4 = vadd.f32 %v673_v3, %v602_v2  ;;  %v1006_v5 = vpop.f32.mrb[3].mxu0 }
 0x358   : > { %752 = vst.msk [vmem:[#allocation4] sm:$0xff] %vm369_vm0, %v750_v4 }
 0x35b   : > { %v760_v8 = vld [vmem:[#allocation4 + $0x8] sm:$0xff] }
 0x35f   : > { %v759_v12 = vld [vmem:[#allocation4] sm:$0xff] }
 0x396   : > { %v771_v6 = vpop.permute.xlu1 %770 }
 0x397   : > { %1117 = vrcp.f32 %v771_v6 }
 0x39a   : > { %v766_v10 = vpop.permute.xlu0 %765 }
 0x39b   : > { %1119 = vrcp.f32 %v766_v10 }
 0x3a1   : > { %v1118_v7 = vpop.eup %1117 }
 0x3a2   : > { %v776_v9 = vmul.f32 %v1118_v7, %v760_v8 }
 0x3a4   : > { %778 = vrot.lane.b32.xlu1 %v776_v9, %s1324_s1 }
 0x3a5   : > { %v1120_v11 = vpop.eup %1119 }
 0x3a6   : > { %v774_v13 = vmul.f32 %v1120_v11, %v759_v12 }
 0x416   : > { %v779_v14 = vpop.permute.xlu1 %778 }
 0x417   : > { %v781_v15 = vsel %vm369_vm0, %v774_v13, %v779_v14 }
 0x418   : > { %782 = vst [vmem:[%s350_s0] sm:$0xff] %v781_v15 }
 0x419   : > { %1224 = shalt.err (!%p1221_p12)
}
 0x41a   : > { %s1225_s13 = scalar_lea.hbm %s1630_s14, 128  ;;  %s1229_s30 = scalar_lea.hbm %s1689_s4, 512 }
 0x41b   : > { %p1226_p10 = scmp.ne.s32.totalorder %s1630_s14, %s1225_s13  ;;  %p1230_p3 = scmp.lt.u32.totalorder %s1630_s14, %s1689_s4 }
 0x41c   : > { %p1231_p2 = scmp.lt.u32.totalorder %s1229_s30, %s1225_s13  ;;  %p1233_p7 = scmp.lt.u32.totalorder %s1225_s13, %s1630_s14 }
 0x41d   : > { %p1227_p4 = pnand %p1226_p10, %p1723_p8 }
 0x41e   : > { %p1232_p0 = por %p1231_p2, %p1230_p3 }
 0x41f   : > { %p1228_p6 = pneg %p1227_p4 }
 0x420   : > { %p1234_p9 = por %p1233_p7, %p1232_p0 }
 0x422   : > { %p1235_p1 = pnand %p1234_p9, %p1228_p6 }
 0x424   : > { %1238 = shalt.err (!%p1235_p1)
}
 0x425   : > { %1018 = dma.vmem_to_hbm [thread:$0]  (%p1723_p8), %s1632_s6, 128, %s1630_s14, %s784_s18  }
 0x426 PF: > { %p1035_p5 = scmp.ge.s32.totalorder %s1313_s22, 2  ;;  %s811_s26 = sand.u32 1, %s1285_s15  }
 0x427   : > { %p1724_p11 = scmp.ne.s32.totalorder %s1710_s8, 0  ;;  %s812_s1 = scalar_lea.sflag [#allocation7], %s811_s26 }
 0x429   : > { %p1031_p13 = pnand %p1035_p5, %p1724_p11 }
 0x42b   : > { %1280 = dma.done.wait (!%p1031_p13), %s812_s1, 128  }
 0x42c   : > { %1282 = vsyncadd (!%p1031_p13), %s812_s1, 4294967168  ;;  %s23_s22 = sadd.s32 1, %s1313_s22   ;;  %s1725_s5 = sld [smem:[#allocation19_spill]] }
 0x42d   : > { %p20_p12 = scmp.ge.s32.totalorder %s23_s22, 6   ;;  %s1726_s18 = sld [smem:[#allocation15_spill]] }
 0x42e   : > { %s1727_s19 = sld [smem:[#allocation16_spill]]  ;;  %s1728_s20 = sld [smem:[#allocation17_spill]] }
 0x42f   : > { %s1729_s21 = sld [smem:[#allocation18_spill]]  ;;  %s1730_s15 = smov %s1289_s16 }
 0x430   : > { %s1731_s16 = smov %s1293_s17  ;;  %22 = sbr.rel (!%p20_p12) target bundleno = 12 (0xc), region = 116 }
 0x432   : > { %s1732_s17 = smov %s1725_s5 }
 0x437   :  { %817 = vsyncpa [#allocation6], 1 }
 0x438   :  { %819 = vsyncpa [#allocation6 + $0x1], 1 }
 0x439   :  { %820 = vsyncpa [#allocation9], 1 }
 0x43a   :  { %822 = vsyncpa [#allocation9 + $0x1], 1 }
 0x43b   :  { %823 = vsyncpa [#allocation7], 1 }
 0x43c   :  { %825 = vsyncpa [#allocation7 + $0x1], 1 }

</bundles_post_ra>
